<compile_context>
chip_gen: v7x
topology: tpu7x:2x2x1
jax: 0.10.0
libtpu: 0.0.40
codegen_flags: <defaults>
</compile_context>

<pallas_src>
import numpy as np
import jax
import jax.numpy as jnp
from jax.experimental import pallas as pl
from jax.experimental.pallas import tpu as pltpu

OUT_DIM = 32            # K == out_dim == GaussianLayer K
BN_EPS = 1e-5
GAUSS_PI = 3.14159      # matches the torch.jit.script gaussian()
TARGET_FOLDED_ROWS = 2048   # ~8192 original rows / grid step at K=32 (~1 MiB blocks)


def _cdiv(a, b):
    return (a + b - 1) // b


def _round_up(x, m):
    return ((x + m - 1) // m) * m


def _fold_width(k):
    """How many original rows fold into one 128-lane row (lane-dense layout)."""
    return 128 // k if (k <= 128 and 128 % k == 0) else 1


def _plan(n_folded_rows, step_multiple=1):
    """Pick (tile_rows, num_steps): tile multiple of 8, steps multiple of
    step_multiple, tile*steps >= n_folded_rows with at most ~8*steps rows pad."""
    n = max(int(n_folded_rows), 1)
    steps = _round_up(_cdiv(n, TARGET_FOLDED_ROWS), step_multiple)
    tile = _round_up(_cdiv(n, steps), 8)
    return tile, steps


# --------------------------------------------------------------------------
# Kernel 1: GaussianLayer — scale * exp(-0.5 * (x*inv_std - mean*inv_std)^2)
#   Lane-dense: x block is (tile, R) (R original rows per folded row); w rows are
#   inv_std masked into lane-block j, so R broadcast-FMAs build x*inv_std over
#   all 128 lanes.  b / scale are (1,128) grid-invariant constants.
# --------------------------------------------------------------------------
def _gaussian_kernel(x_ref, w_ref, b_ref, scale_ref, o_ref):
    x = x_ref[...]                           # (tile, R)
    w = w_ref[...]                           # (R, 128): row j = inv_std in lane block j
    z = x[:, 0:1] * w[0:1, :]
    for j in range(1, x.shape[1]):
        z = z + x[:, j:j + 1] * w[j:j + 1, :]
    z = z - b_ref[...]                       # = (x - mean) * inv_std
    o_ref[...] = jnp.exp(-0.5 * z * z) * scale_ref[...]


def gaussian_layer(x, means, stds):
    """x: (E,) float -> (E, K) float32."""
    E = int(x.shape[0])
    K = int(means.shape[1])
    if E == 0:
        return jnp.zeros((0, K), jnp.float32)

    R = _fold_width(K)          # 4 for K=32
    W = R * K                   # 128
    Ef = _cdiv(E, R)
    tile, steps = _plan(Ef)
    Ef_pad = tile * steps
    total = Ef_pad * R

    xp = jnp.zeros((total,), jnp.float32).at[:E].set(x.astype(jnp.float32))
    xf = xp.reshape(Ef_pad, R)

    std = jnp.abs(stds.astype(jnp.float32)) + 0.01          # (1, K)
    inv_std = 1.0 / std                                      # hoisted divide
    scale = inv_std * np.float32(1.0 / np.sqrt(2.0 * GAUSS_PI))
    # w[j, j*K:(j+1)*K] = inv_std, zeros elsewhere  (R, W)
    w = jnp.kron(jnp.eye(R, dtype=jnp.float32), inv_std)
    b = jnp.tile(means.astype(jnp.float32) * inv_std, (1, R))   # (1, W)
    scale_t = jnp.tile(scale, (1, R))                            # (1, W)

    out = pl.pallas_call(
        _gaussian_kernel,
        out_shape=jax.ShapeDtypeStruct((Ef_pad, W), jnp.float32),
        grid=(steps,),
        in_specs=[
            pl.BlockSpec((tile, R), lambda i: (i, 0)),
            pl.BlockSpec((R, W), lambda i: (0, 0)),
            pl.BlockSpec((1, W), lambda i: (0, 0)),
            pl.BlockSpec((1, W), lambda i: (0, 0)),
        ],
        out_specs=pl.BlockSpec((tile, W), lambda i: (i, 0)),
        compiler_params=pltpu.CompilerParams(
            dimension_semantics=("parallel",)),
    )(xf, w, b, scale_t)
    return out.reshape(total, K)[:E]


# --------------------------------------------------------------------------
# Kernel 2A: per-channel shifted sum / sum-of-squares of v (lane-dense).
#   Grid = (2 cores, steps-per-core).  Each core owns one 128-lane block of the
#   (8, 2*128) stats outputs (resident accumulators over the "arbitrary" axis);
#   the core axis is "parallel" so v7x megacore splits pass A across both TCs.
#   Padded rows equal the shift constant c, so they contribute exactly 0.
# --------------------------------------------------------------------------
def _stats_kernel(v_ref, c_ref, sum_ref, sumsq_ref):
    @pl.when(pl.program_id(1) == 0)
    def _():
        sum_ref[...] = jnp.zeros_like(sum_ref)
        sumsq_ref[...] = jnp.zeros_like(sumsq_ref)

    v = v_ref[...] - c_ref[...]                              # shifted (tile, W)
    sum_ref[...] = sum_ref[...] + jnp.sum(v, axis=0, keepdims=True)
    sumsq_ref[...] = sumsq_ref[...] + jnp.sum(v * v, axis=0, keepdims=True)


# --------------------------------------------------------------------------
# Kernel 2B: folded BN affine — out = v * scale + shift   (lane-dense)
# --------------------------------------------------------------------------
def _norm_kernel(v_ref, scale_ref, shift_ref, o_ref):
    o_ref[...] = v_ref[...] * scale_ref[...] + shift_ref[...]


def batchnorm_edges(v, gamma, beta):
    """v: (E, K) float32 (already includes loc).  Training-mode BatchNorm1d with
    default affine (gamma=1, beta=0) folded into one scale/shift per channel."""
    E, K = int(v.shape[0]), int(v.shape[1])
    if E == 0:
        return jnp.zeros((0, K), jnp.float32)

    R = _fold_width(K)
    W = R * K
    cores = 2 if W % 128 == 0 else 1
    Ef = _cdiv(E, R)
    tile, steps = _plan(Ef, step_multiple=cores)
    g_per_core = steps // cores
    Ef_pad = tile * steps
    total = Ef_pad * R

    v = v.astype(jnp.float32)
    # Shift constant for numerically-stable one-pass variance (mean of a prefix).
    c = jnp.mean(v[: min(E, 1024)], axis=0, keepdims=True)          # (1, K)
    pad_rows = total - E
    # Invariant: padded rows == c so they contribute 0 to both shifted statistics.
    vpad = jnp.concatenate([v, jnp.broadcast_to(c, (pad_rows, K))], axis=0)
    vf = vpad.reshape(Ef_pad, W)                                      # lane-dense fold
    c_t = jnp.tile(c, (1, R))                                         # (1, W)

    stats_sum, stats_sq = pl.pallas_call(
        _stats_kernel,
        out_shape=(
            jax.ShapeDtypeStruct((8, cores * W), jnp.float32),
            jax.ShapeDtypeStruct((8, cores * W), jnp.float32),
        ),
        grid=(cores, g_per_core),
        in_specs=[
            pl.BlockSpec((tile, W), lambda ci, i: (ci * g_per_core + i, 0)),
            pl.BlockSpec((1, W), lambda ci, i: (0, 0)),
        ],
        out_specs=(
            pl.BlockSpec((8, W), lambda ci, i: (0, ci)),
            pl.BlockSpec((8, W), lambda ci, i: (0, ci)),
        ),
        compiler_params=pltpu.CompilerParams(
            dimension_semantics=("parallel", "arbitrary")),
    )(vf, c_t)

    # Fold stats (tiny host-side math): un-fold lanes/cores, un-shift, make affine.
    s = stats_sum[0].reshape(cores * R, K).sum(axis=0)                # (K,)
    ss = stats_sq[0].reshape(cores * R, K).sum(axis=0)
    inv_n = np.float32(1.0 / E)
    mu_s = s * inv_n
    var = jnp.maximum(ss * inv_n - mu_s * mu_s, 0.0)                  # biased (training BN)
    mu = mu_s + c[0]
    scale = gamma.reshape(-1) * jax.lax.rsqrt(var + BN_EPS)
    shift = beta.reshape(-1) - mu * scale
    scale_t = jnp.tile(scale.reshape(1, K), (1, R))                   # (1, W)
    shift_t = jnp.tile(shift.reshape(1, K), (1, R))

    out = pl.pallas_call(
        _norm_kernel,
        out_shape=jax.ShapeDtypeStruct((Ef_pad, W), jnp.float32),
        grid=(steps,),
        in_specs=[
            pl.BlockSpec((tile, W), lambda i: (i, 0)),
            pl.BlockSpec((1, W), lambda i: (0, 0)),
            pl.BlockSpec((1, W), lambda i: (0, 0)),
        ],
        out_specs=pl.BlockSpec((tile, W), lambda i: (i, 0)),
        compiler_params=pltpu.CompilerParams(
            dimension_semantics=("parallel",)),
    )(vf, scale_t, shift_t)
    return out.reshape(total, K)[:E]


# --------------------------------------------------------------------------
# Parameter init (deterministic, mirrors __init__ shapes)
# --------------------------------------------------------------------------
def init_params(key, out_dim):
    k1, k2, k3, k4 = jax.random.split(key, 4)
    xavier_std = np.sqrt(2.0 / (2 + out_dim))  # xavier_normal_ for Linear(2, out_dim)
    return {
        "gbk_means": jax.random.uniform(k1, (1, out_dim), jnp.float32, 0.0, 3.0),
        "gbk_stds": jax.random.uniform(k2, (1, out_dim), jnp.float32, 0.0, 3.0),
        # stored transposed: (2, out_dim) so loc is pos @ W^T
        "w_src_t": jax.random.normal(k3, (2, out_dim), jnp.float32) * xavier_std,
        "w_dst_t": jax.random.normal(k4, (2, out_dim), jnp.float32) * xavier_std,
        "bn_gamma": jnp.ones((1, out_dim), jnp.float32),   # BatchNorm1d default affine
        "bn_beta": jnp.zeros((1, out_dim), jnp.float32),
    }


# --------------------------------------------------------------------------
# Full forward (Pallas kernels + index-bookkeeping glue)
# --------------------------------------------------------------------------
def rd_stem_edge_encoder_forward(params, batch):
    K = OUT_DIM
    rd_index = np.asarray(batch["rd_index"])
    edge_index = np.asarray(batch["edge_index"])
    edge_attr = batch["edge_attr"]
    num_nodes = int(batch["num_nodes"])

    # pe_gbk: GaussianLayer (Pallas kernel 1, lane-dense)
    out_val = gaussian_layer(batch["rd_val"], params["gbk_means"], params["gbk_stds"])

    if edge_attr is None:
        edge_attr = jnp.zeros((edge_index.shape[1], K), jnp.float32)

    # concat + coalesce(add)
    # TODO(synk): torch_sparse.coalesce is a data-dependent sparse dedup; done as
    # host-side np.unique + jax segment_sum glue, not a Pallas kernel.
    cat_idx = np.concatenate([edge_index, rd_index], axis=1)
    cat_val = jnp.concatenate([jnp.asarray(edge_attr, jnp.float32), out_val], axis=0)
    lin = cat_idx[0].astype(np.int64) * num_nodes + cat_idx[1].astype(np.int64)
    uniq, inv = np.unique(lin, return_inverse=True)
    coal_val = jax.ops.segment_sum(cat_val, jnp.asarray(inv, jnp.int32),
                                   num_segments=int(uniq.shape[0]))
    coal_idx = np.stack([uniq // num_nodes, uniq % num_nodes], axis=0).astype(np.int32)

    # loc Linear(2,K) layers: degenerate (E,4)@(4,K) shape -> exact f32 broadcast
    # FMAs in XLA (negligible FLOPs, fuses with the padding pass feeding BN).
    pos = jnp.asarray(batch["pos"], jnp.float32)
    ps = pos[coal_idx[0]]
    pd = pos[coal_idx[1]]
    ws, wd = params["w_src_t"], params["w_dst_t"]
    loc = (ps[:, 0:1] * ws[0] + ps[:, 1:2] * ws[1]
           + pd[:, 0:1] * wd[0] + pd[:, 1:2] * wd[1])
    v = coal_val + loc

    # post_norm: training-mode BatchNorm1d (Pallas kernels 2A/2B)
    out = batchnorm_edges(v, params["bn_gamma"], params["bn_beta"])

    # stem: cfg.gt.stem.num_layers defaults to 0 -> nn.Identity
    return coal_idx, out


# --------------------------------------------------------------------------
# Pure-numpy reference for verification
# --------------------------------------------------------------------------
def reference_forward(params, batch):
    K = OUT_DIM
    means = np.asarray(params["gbk_means"])
    stds = np.abs(np.asarray(params["gbk_stds"])) + 0.01
    x = np.asarray(batch["rd_val"], np.float32).reshape(-1, 1)
    a = (2.0 * GAUSS_PI) ** 0.5
    out_val = np.exp(-0.5 * ((x - means) / stds) ** 2) / (a * stds)

    edge_index = np.asarray(batch["edge_index"])
    edge_attr = np.asarray(batch["edge_attr"], np.float32)
    cat_idx = np.concatenate([edge_index, np.asarray(batch["rd_index"])], axis=1)
    cat_val = np.concatenate([edge_attr, out_val], axis=0)
    N = int(batch["num_nodes"])
    lin = cat_idx[0].astype(np.int64) * N + cat_idx[1].astype(np.int64)
    uniq, inv = np.unique(lin, return_inverse=True)
    coal = np.zeros((uniq.shape[0], K), np.float32)
    np.add.at(coal, inv, cat_val)
    src = (uniq // N).astype(np.int32)
    dst = (uniq % N).astype(np.int32)

    pos = np.asarray(batch["pos"], np.float32)
    v = coal + pos[src] @ np.asarray(params["w_src_t"]) \
             + pos[dst] @ np.asarray(params["w_dst_t"])
    mu = v.mean(0, keepdims=True)
    var = ((v - mu) ** 2).mean(0, keepdims=True)
    out = (v - mu) / np.sqrt(var + BN_EPS) * np.asarray(params["bn_gamma"]) \
          + np.asarray(params["bn_beta"])
    return np.stack([src, dst]), out


if __name__ == "__main__":
    key = jax.random.PRNGKey(0)
    kp, k_e, k_rd, k_val, k_pos, k_attr = jax.random.split(key, 6)

    params = init_params(kp, OUT_DIM)

    N_NODES = 12
    E_EDGE = 20
    E_RD = 30
    batch = {
        "num_nodes": N_NODES,
        "edge_index": np.asarray(
            jax.random.randint(k_e, (2, E_EDGE), 0, N_NODES, jnp.int32)),
        "edge_attr": jax.random.normal(k_attr, (E_EDGE, OUT_DIM), jnp.float32),
        "rd_index": np.asarray(
            jax.random.randint(k_rd, (2, E_RD), 0, N_NODES, jnp.int32)),
        "rd_val": jax.random.uniform(k_val, (E_RD,), jnp.float32, 0.0, 4.0),
        "pos": jax.random.uniform(k_pos, (N_NODES, 2), jnp.float32),
    }

    new_edge_index, new_edge_attr = rd_stem_edge_encoder_forward(params, batch)
    new_edge_attr = jax.block_until_ready(new_edge_attr)

    ref_idx, ref_attr = reference_forward(params, batch)
    assert new_edge_index.shape == ref_idx.shape
    assert np.array_equal(new_edge_index, ref_idx), "edge index mismatch"
    assert np.allclose(np.asarray(new_edge_attr), ref_attr, atol=1e-3, rtol=1e-3), \
        "edge attr mismatch"

    print("KERNEL_OK")
</pallas_src>

<mosaic_0001>
module attributes {stable_mosaic.version = 11 : i64} {
  func.func @_gaussian_kernel(%arg0: i32, %arg1: memref<8x4xf32, #tpu.memory_space<vmem>>, %arg2: memref<4x128xf32, #tpu.memory_space<vmem>>, %arg3: memref<1x128xf32, #tpu.memory_space<vmem>>, %arg4: memref<1x128xf32, #tpu.memory_space<vmem>>, %arg5: memref<8x128xf32, #tpu.memory_space<vmem>>) attributes {dimension_semantics = [#tpu.dimension_semantics<parallel>], iteration_bounds = array<i64: 1>, scalar_prefetch = 0 : i64, scratch_operands = 0 : i64, tpu.core_type = #tpu.core_type<tc>, window_params = [{transform_indices = @transform_0, window_bounds = array<i64: 8, 4>}, {pipeline_mode = #tpu.pipeline_mode<synchronous>, transform_indices = @transform_1, window_bounds = array<i64: 4, 128>}, {pipeline_mode = #tpu.pipeline_mode<synchronous>, transform_indices = @transform_2, window_bounds = array<i64: 1, 128>}, {pipeline_mode = #tpu.pipeline_mode<synchronous>, transform_indices = @transform_3, window_bounds = array<i64: 1, 128>}, {transform_indices = @transform_4, window_bounds = array<i64: 8, 128>}]} {
    %c0 = arith.constant 0 : index
    %c0_0 = arith.constant 0 : index
    %0 = vector.load %arg1[%c0, %c0_0] : memref<8x4xf32, #tpu.memory_space<vmem>>, vector<8x4xf32>
    %c0_1 = arith.constant 0 : index
    %c0_2 = arith.constant 0 : index
    %1 = vector.load %arg2[%c0_1, %c0_2] : memref<4x128xf32, #tpu.memory_space<vmem>>, vector<4x128xf32>
    %2 = vector.extract_strided_slice %0 {offsets = [0, 0], sizes = [8, 1], strides = [1, 1]} : vector<8x4xf32> to vector<8x1xf32>
    %3 = vector.extract_strided_slice %1 {offsets = [0, 0], sizes = [1, 128], strides = [1, 1]} : vector<4x128xf32> to vector<1x128xf32>
    %4 = vector.broadcast %2 : vector<8x1xf32> to vector<8x128xf32>
    %5 = vector.broadcast %3 : vector<1x128xf32> to vector<8x128xf32>
    %6 = arith.mulf %4, %5 : vector<8x128xf32>
    %7 = vector.extract_strided_slice %0 {offsets = [0, 1], sizes = [8, 1], strides = [1, 1]} : vector<8x4xf32> to vector<8x1xf32>
    %8 = vector.extract_strided_slice %1 {offsets = [1, 0], sizes = [1, 128], strides = [1, 1]} : vector<4x128xf32> to vector<1x128xf32>
    %9 = vector.broadcast %7 : vector<8x1xf32> to vector<8x128xf32>
    %10 = vector.broadcast %8 : vector<1x128xf32> to vector<8x128xf32>
    %11 = arith.mulf %9, %10 : vector<8x128xf32>
    %12 = arith.addf %6, %11 : vector<8x128xf32>
    %13 = vector.extract_strided_slice %0 {offsets = [0, 2], sizes = [8, 1], strides = [1, 1]} : vector<8x4xf32> to vector<8x1xf32>
    %14 = vector.extract_strided_slice %1 {offsets = [2, 0], sizes = [1, 128], strides = [1, 1]} : vector<4x128xf32> to vector<1x128xf32>
    %15 = vector.broadcast %13 : vector<8x1xf32> to vector<8x128xf32>
    %16 = vector.broadcast %14 : vector<1x128xf32> to vector<8x128xf32>
    %17 = arith.mulf %15, %16 : vector<8x128xf32>
    %18 = arith.addf %12, %17 : vector<8x128xf32>
    %19 = vector.extract_strided_slice %0 {offsets = [0, 3], sizes = [8, 1], strides = [1, 1]} : vector<8x4xf32> to vector<8x1xf32>
    %20 = vector.extract_strided_slice %1 {offsets = [3, 0], sizes = [1, 128], strides = [1, 1]} : vector<4x128xf32> to vector<1x128xf32>
    %21 = vector.broadcast %19 : vector<8x1xf32> to vector<8x128xf32>
    %22 = vector.broadcast %20 : vector<1x128xf32> to vector<8x128xf32>
    %23 = arith.mulf %21, %22 : vector<8x128xf32>
    %24 = arith.addf %18, %23 : vector<8x128xf32>
    %c0_3 = arith.constant 0 : index
    %c0_4 = arith.constant 0 : index
    %25 = vector.load %arg3[%c0_3, %c0_4] : memref<1x128xf32, #tpu.memory_space<vmem>>, vector<1x128xf32>
    %26 = vector.broadcast %25 : vector<1x128xf32> to vector<8x128xf32>
    %27 = arith.subf %24, %26 : vector<8x128xf32>
    %cst = arith.constant -5.000000e-01 : f32
    %28 = vector.broadcast %cst : f32 to vector<8x128xf32>
    %29 = arith.mulf %28, %27 : vector<8x128xf32>
    %30 = arith.mulf %29, %27 : vector<8x128xf32>
    %31 = math.exp %30 : vector<8x128xf32>
    %c0_5 = arith.constant 0 : index
    %c0_6 = arith.constant 0 : index
    %32 = vector.load %arg4[%c0_5, %c0_6] : memref<1x128xf32, #tpu.memory_space<vmem>>, vector<1x128xf32>
    %33 = vector.broadcast %32 : vector<1x128xf32> to vector<8x128xf32>
    %34 = arith.mulf %31, %33 : vector<8x128xf32>
    %c0_7 = arith.constant 0 : index
    %c0_8 = arith.constant 0 : index
    %35 = vector.load %arg5[%c0_7, %c0_8] : memref<8x128xf32, #tpu.memory_space<vmem>>, vector<8x128xf32>
    tpu.vector_store %arg5[%c0_7, %c0_8], %34 {strides = array<i32>} : memref<8x128xf32, #tpu.memory_space<vmem>>, vector<8x128xf32>,
    return
  }
  func.func @transform_0(%arg0: i32) -> (i32, i32) {
    %c0_i32 = arith.constant 0 : i32
    %c0_i32_0 = arith.constant 0 : i32
    return %arg0, %c0_i32 : i32, i32
  }
  func.func @transform_1(%arg0: i32) -> (i32, i32) {
    %c0_i32 = arith.constant 0 : i32
    %c0_i32_0 = arith.constant 0 : i32
    %c0_i32_1 = arith.constant 0 : i32
    return %c0_i32, %c0_i32_0 : i32, i32
  }
  func.func @transform_2(%arg0: i32) -> (i32, i32) {
    %c0_i32 = arith.constant 0 : i32
    %c0_i32_0 = arith.constant 0 : i32
    %c0_i32_1 = arith.constant 0 : i32
    return %c0_i32, %c0_i32_0 : i32, i32
  }
  func.func @transform_3(%arg0: i32) -> (i32, i32) {
    %c0_i32 = arith.constant 0 : i32
    %c0_i32_0 = arith.constant 0 : i32
    %c0_i32_1 = arith.constant 0 : i32
    return %c0_i32, %c0_i32_0 : i32, i32
  }
  func.func @transform_4(%arg0: i32) -> (i32, i32) {
    %c0_i32 = arith.constant 0 : i32
    %c0_i32_0 = arith.constant 0 : i32
    return %arg0, %c0_i32 : i32, i32
  }
}

</mosaic_0001>

<bundles_post_ra>
// kernel: tpu_custom_call.1
= control target key start
LH: loop header
LB: loop body
LE: loop exit
PB: predicated region body
PF: predicated region fallthrough
CT: control target
= control target key end

     0   :  { %v133_v1 = vmov 0   ;;  %v134_v2 = vmov 2   ;;  %s187_s0 = inlined_call_operand.vmem [shape: f32[8,4], index: 0, kind: input, shape index: {}]   ;;  %s188_s1 = inlined_call_operand.vmem [shape: f32[4,128], index: 1, kind: input, shape index: {}]   ;;  %s189_s2 = inlined_call_operand.vmem [shape: f32[1,128], index: 2, kind: input, shape index: {}]   ;;  %s190_s3 = inlined_call_operand.vmem [shape: f32[1,128], index: 3, kind: input, shape index: {}]   ;;  %s191_s4 = inlined_call_operand.hbm [shape: f32[8,128], index: 4, kind: output, shape index: {}]  }
   0x1   :  { %v18_v0 = vld [vmem:[%s187_s0] sm:$0xff]  ;;  %102 = vset.pattern.permute.xlu0 %v133_v1  ;;  %104 = vset.pattern.permute.xlu1 %v134_v2 }
   0x2   :  { %9 = vsyncpa [#allocation3], 0  ;;  %22 = vperm.xlu0 %102, %v18_v0   ;;  %41 = vperm.xlu1 %104, %v18_v0   ;;  %v135_v3 = vmov 1   ;;  %v136_v4 = vmov 3   ;;  %v25_v5 = vlaneseq  ;;  %v19_v9 = vld [vmem:[%s188_s1] sm:$0xf] }
   0x3   :  { %v95_v26 = vld [vmem:[%s189_s2] ss:$0 sm:$0xff]  ;;  %s137_s21 = smov [#allocation2]  }
   0x4   :  { %v26_v6 = vshrl.u32 %v25_v5, 7  ;;  %v96_v32 = vld [vmem:[%s190_s3] ss:$0 sm:$0xff]  ;;  %s87_s22 = sshll.u32 %s137_s21, 4  ;;  %s88_s22 = int_to_ptr.vmem [resolvable:$true] %s87_s22 }
   0x5   :  { %s109_s23 = scalar_lea.vmem %s88_s22, 128  ;;  %p114_p1 = scmp.lt.s32.totalorder %s88_s22, %s88_s22 }
   0x6   :  { %103 = vset.pattern.permute.xlu0 %v135_v3  ;;  %105 = vset.pattern.permute.xlu1 %v136_v4  ;;  %v27_v7 = vsub.s32 0, %v26_v6  ;;  %v36_v8 = vsub.s32 1, %v26_v6  ;;  %v46_v11 = vsub.s32 2, %v26_v6  ;;  %v56_v13 = vsub.s32 3, %v26_v6  ;;  %p110_p0 = scmp.ne.s32.totalorder %s88_s22, %s109_s23  ;;  %p115_p2 = scmp.lt.s32.totalorder %s109_s23, %s109_s23 }
   0x7   :  { %31 = vperm.xlu0 %103, %v18_v0   ;;  %51 = vperm.xlu1 %105, %v18_v0  }
   0x8   :  { %v28_v14 = vrot.slane %v19_v9, %v27_v7  ;;  %v37_v15 = vrot.slane %v19_v9, %v36_v8  ;;  %v47_v16 = vrot.slane %v19_v9, %v46_v11  ;;  %v57_v17 = vrot.slane %v19_v9, %v56_v13  ;;  %p116_p3 = por %p115_p2, %p114_p1 }
   0xa   :  { %p117_p4 = pnand %p116_p3, %p110_p0 }
   0xb   :  { %106 = vset.pattern.permute.xlu0 %v136_v4 }
  0x81   :  { %v23_v10 = vpop.permute.xlu0 %22  ;;  %v42_v12 = vpop.permute.xlu1 %41 }
  0x82   :  { %v29_v20 = vmul.f32 %v28_v14, %v23_v10  ;;  %v48_v22 = vmul.f32 %v47_v16, %v42_v12 }
  0x86   :  { %v32_v18 = vpop.permute.xlu0 %31  ;;  %v52_v19 = vpop.permute.xlu1 %51 }
  0x87   :  { %v38_v21 = vmul.f32 %v37_v15, %v32_v18  ;;  %v58_v24 = vmul.f32 %v57_v17, %v52_v19 }
  0x89   :  { %v39_v23 = vadd.f32 %v38_v21, %v29_v20 }
  0x8b   :  { %v49_v25 = vadd.f32 %v48_v22, %v39_v23 }
  0x8d   :  { %v59_v27 = vadd.f32 %v58_v24, %v49_v25 }
  0x8f   :  { %v67_v28 = vsub.f32 %v59_v27, %v95_v26 }
  0x91   :  { %v68_v29 = vmul.f32 -0.5, %v67_v28 }
  0x93   :  { %v69_v30 = vmul.f32 %v68_v29, %v67_v28 }
  0x95   :  { %v70_v31 = vmul.f32 1.442695, %v69_v30 }
  0x97   :  { %107 = vpow2.f32 %v70_v31 }
  0xa1   :  { %v108_v33 = vpop.eup %107 }
  0xa2   :  { %v79_v34 = vmul.f32 %v108_v33, %v96_v32 }
  0xa4   :  { %80 = vst [vmem:[#allocation2] sm:$0xff] %v79_v34 }
  0xa5   :  { %120 = shalt.err (!%p117_p4)
}
  0xa6   :  { %s121_s25 = scalar_lea.hbm %s191_s4, 128 }
  0xa7   :  { %p122_p5 = scmp.ne.s32.totalorder %s191_s4, %s121_s25  ;;  %p125_p6 = scmp.lt.u32.totalorder %s121_s25, %s191_s4 }
  0xa9   :  { %p127_p7 = pnand %p125_p6, %p122_p5 }
  0xab   :  { %130 = shalt.err (!%p127_p7)
}
  0xac   :  { %90 = dma.vmem_to_hbm [thread:$0]  %s88_s22, 128, %s191_s4, [#allocation3]  }
  0xad   :  { %131 = dma.done.wait [#allocation3], 128  }
  0xae   :  { %132 = vsyncadd [#allocation3], 4294967168 }
  0xaf   :  { %94 = vsyncpa [#allocation3], 1 }

</bundles_post_ra>
